<compile_context>
chip_gen: v6e
topology: v6e:2x2x1
jax: 0.10.0
libtpu: 0.0.40
codegen_flags: <defaults>
</compile_context>

<pallas_src>
import numpy as np
import jax
import jax.numpy as jnp
from jax.experimental import pallas as pl
from jax.experimental.pallas import tpu as pltpu


def _round_up(x, m):
    return (x + m - 1) // m * m


def _tpu_vmem_bytes():
    try:
        return int(getattr(pltpu.get_tpu_info(), "vmem_capacity_bytes"))
    except Exception:
        return 64 * 1024 * 1024          # conservative (v7x-sized) fallback


def _gen_tiling():
    """Per-generation (column-tile cap, scoped-VMEM limit)."""
    vmem = _tpu_vmem_bytes()
    if vmem >= 100 * 1024 * 1024:        # v5e / v6e: 128 MiB physical VMEM
        return 1024, 64 * 1024 * 1024
    return 512, 40 * 1024 * 1024         # v7x: 64 MiB physical VMEM


# ---------------------------------------------------------------------------
# Pallas kernel: fused 2-layer MLP  (Linear -> bias -> ReLU -> Linear -> bias)
# grid = (out_col_tiles, batch_tiles); column tiles are the OUTER axis so each
# w2 column tile is fetched from HBM once.  Layer 1 is recomputed per tile
# (cheap), so the kernel is stateless and both grid axes are 'parallel'.
# ---------------------------------------------------------------------------
def _fused_mlp_kernel(x_ref, w1_ref, b1_ref, w2_ref, b2_ref, o_ref):
    h = jnp.dot(x_ref[...], w1_ref[...], preferred_element_type=jnp.float32)
    h = jnp.maximum(h + b1_ref[...], 0.0).astype(w2_ref.dtype)   # one cast, f32 acc kept
    y = jnp.dot(h, w2_ref[...], preferred_element_type=jnp.float32)
    o_ref[...] = (y + b2_ref[...]).astype(o_ref.dtype)


# ---------------------------------------------------------------------------
# One-time weight preparation (do NOT call per forward step)
# ---------------------------------------------------------------------------
def prepare_fused_mlp(w1, b1, w2, b2, *, compute_dtype=jnp.bfloat16, tn=None):
    """Pad / cast / tile-select the weights once.

    w1: (F_in, H);  b1: (H,)/(1,H);  w2: (H, F_out);  b2: (F_out,)/(1,F_out)
    """
    w1 = jnp.asarray(w1)
    w2 = jnp.asarray(w2)
    b1 = jnp.asarray(b1).reshape(1, -1).astype(jnp.float32)
    b2 = jnp.asarray(b2).reshape(1, -1).astype(jnp.float32)
    F_in, H = w1.shape
    H2, F_out = w2.shape
    assert H == H2, (w1.shape, w2.shape)

    cdt = jnp.dtype(compute_dtype) if compute_dtype is not None else w1.dtype
    pack = 2 if cdt == jnp.dtype(jnp.bfloat16) else 1

    # Hidden dim: pad only to the sublane packing multiple (NOT 128) — padding
    # H to 128 would double streamed w2 bytes for the typical hid=(64,) decoder.
    Hp = _round_up(H, 8 * pack)

    tn_cap, vmem_limit = _gen_tiling()
    if tn is None:
        tn = min(tn_cap, _round_up(F_out, 128))   # lane-dense column tile
    tn = _round_up(tn, 128)
    Fp = _round_up(F_out, tn)

    def pad2(a, rows, cols):
        pr, pc = rows - a.shape[0], cols - a.shape[1]
        return a if (pr == 0 and pc == 0) else jnp.pad(a, ((0, pr), (0, pc)))

    return dict(
        w1=pad2(w1.astype(cdt), F_in, Hp),
        b1=pad2(b1, 1, Hp),
        w2=pad2(w2.astype(cdt), Hp, Fp),
        b2=pad2(b2, 1, Fp),
        F_in=F_in, H=H, Hp=Hp, F_out=F_out, Fp=Fp, tn=tn,
        compute_dtype=cdt, vmem_limit=vmem_limit,
    )


def fused_mlp_apply(prep, x, *, use_pallas=None):
    """relu(x @ w1 + b1) @ w2 + b2 using pre-prepared weights.

    x : (B, F_in).  Returns (B, F_out) in x's original dtype (f32 accumulation).
    use_pallas: True/False force, None = auto (tiny problems bypass to XLA).
    """
    x = jnp.asarray(x)
    B, F_in = x.shape
    assert F_in == prep["F_in"], (F_in, prep["F_in"])
    out_dtype = x.dtype
    cdt = prep["compute_dtype"]
    H, Hp, F_out, Fp, tn = prep["H"], prep["Hp"], prep["F_out"], prep["Fp"], prep["tn"]

    if use_pallas is None:
        flops = 2 * B * (F_in * H + H * F_out)
        use_pallas = flops >= (1 << 22)          # below ~4 MFLOP launch/pad dominates

    if not use_pallas:
        # Small-problem bypass: same math, plain XLA. Padded columns/rows are zeros.
        h = jnp.dot(x.astype(cdt), prep["w1"],
                    preferred_element_type=jnp.float32) + prep["b1"]
        h = jnp.maximum(h, 0.0).astype(cdt)
        y = jnp.dot(h, prep["w2"],
                    preferred_element_type=jnp.float32) + prep["b2"]
        return y[:, :F_out].astype(out_dtype)

    # --- batch tiling (rows packed 16/vreg for bf16, 8 for f32) -------------
    row_align = 16 if cdt == jnp.dtype(jnp.bfloat16) else 8
    tb = min(256, _round_up(B, row_align))
    tb = _round_up(tb, row_align)
    Bp = _round_up(B, tb)

    xp = x.astype(cdt)
    if Bp != B:
        xp = jnp.pad(xp, ((0, Bp - B), (0, 0)))

    grid = (Fp // tn, Bp // tb)                  # column tiles OUTER -> w2 streamed once

    grid_spec = pltpu.PrefetchScalarGridSpec(
        num_scalar_prefetch=0,
        grid=grid,
        in_specs=[
            pl.BlockSpec((tb, F_in), lambda j, i: (i, 0)),   # x batch tile
            pl.BlockSpec((F_in, Hp), lambda j, i: (0, 0)),   # w1 (resident, const index)
            pl.BlockSpec((1, Hp),    lambda j, i: (0, 0)),   # b1 (resident)
            pl.BlockSpec((Hp, tn),   lambda j, i: (0, j)),   # w2 column tile
            pl.BlockSpec((1, tn),    lambda j, i: (0, j)),   # b2 column tile
        ],
        out_specs=pl.BlockSpec((tb, tn), lambda j, i: (i, j)),
    )
    yp = pl.pallas_call(
        _fused_mlp_kernel,
        out_shape=jax.ShapeDtypeStruct((Bp, Fp), out_dtype),
        grid_spec=grid_spec,
        compiler_params=pltpu.CompilerParams(
            dimension_semantics=("parallel", "parallel"),    # stateless -> dual-TC safe
            vmem_limit_bytes=prep["vmem_limit"]),
    )(xp, prep["w1"], prep["b1"], prep["w2"], prep["b2"])

    return yp[:B, :F_out]


# ---------------------------------------------------------------------------
# MLPDecoder parameters + forward (glue in plain JAX, compute in the kernel)
# ---------------------------------------------------------------------------
def init_mlp_decoder_params(key, in_features, hid, out_shape, num_classes,
                            dtype=jnp.float32):
    """Deterministic synthetic init (shapes match the PyTorch module)."""
    h0 = hid[0]
    out_feat = int(np.prod(out_shape))
    cls_feat = num_classes * out_shape[0]
    k1, k2, k3, k4, k5, k6 = jax.random.split(key, 6)
    scale = 0.05
    return dict(
        # mlp.fc[0] : Linear(in_features, hid[0])   (stored transposed)
        w1=scale * jax.random.normal(k1, (in_features, h0), dtype),
        b1=scale * jax.random.normal(k2, (1, h0), dtype),
        # mlp.fc[2] : Linear(hid[0], prod(out_shape))
        w2=scale * jax.random.normal(k3, (h0, out_feat), dtype),
        b2=scale * jax.random.normal(k4, (1, out_feat), dtype),
        # class_layer_predictor[1] : Linear(hid[0], num_classes*out_shape[0])
        wc=scale * jax.random.normal(k5, (h0, cls_feat), dtype),
        bc=scale * jax.random.normal(k6, (1, cls_feat), dtype),
    )


def prepare_mlp_decoder(params, out_shape, num_classes,
                        max_shape=(1, 1, 1, 1), compute_dtype=jnp.bfloat16):
    """One-time prep of both decoder heads (call once, reuse across forwards)."""
    os0, os1, os2, os3 = out_shape
    do_slice = sum(max_shape[2:]) > 0
    m2 = min(int(max_shape[2]), os2) if do_slice else os2
    m3 = min(int(max_shape[3]), os3) if do_slice else os3

    w2, b2 = params["w2"], params["b2"]
    if do_slice and (m2 < os2 or m3 < os3):
        # Fold the static spatial slice into a column selection of w2/b2 ONCE:
        # identical to compute-then-slice, but the discarded columns are never
        # computed, streamed or stored.
        cols = (np.arange(os0 * os1)[:, None, None] * (os2 * os3)
                + np.arange(m2)[None, :, None] * os3
                + np.arange(m3)[None, None, :]).reshape(-1)
        w2 = w2[:, cols]
        b2 = b2[..., cols]

    return dict(
        main=prepare_fused_mlp(params["w1"], params["b1"], w2, b2,
                               compute_dtype=compute_dtype),
        cls=prepare_fused_mlp(params["w1"], params["b1"], params["wc"], params["bc"],
                              compute_dtype=compute_dtype),
        out_shape=tuple(out_shape),
        num_classes=num_classes,
        sliced_shape=(os0, os1, m2, m3),
    )


def mlp_decoder_forward(prep, x, class_pred=False, use_pallas=None):
    if class_pred:
        out_shape = prep["out_shape"]
        # Same implicit assumption as the PyTorch view(): os0 == os1.
        assert out_shape[0] == out_shape[1], out_shape
        y = fused_mlp_apply(prep["cls"], x, use_pallas=use_pallas)
        return y.reshape(x.shape[0], prep["num_classes"], out_shape[1])
    y = fused_mlp_apply(prep["main"], x, use_pallas=use_pallas)
    return y.reshape(-1, *prep["sliced_shape"])


# ---------------------------------------------------------------------------
# Pure-JAX reference (full compute + post-slice, i.e. the original semantics)
# ---------------------------------------------------------------------------
def _ref_mlp(x, w1, b1, w2, b2, compute_dtype):
    out_dtype = x.dtype
    if compute_dtype is not None:
        x = x.astype(compute_dtype)
        w1 = w1.astype(compute_dtype)
        w2 = w2.astype(compute_dtype)
    h = (jnp.dot(x, w1, preferred_element_type=jnp.float32)
         + jnp.asarray(b1, jnp.float32).reshape(1, -1))
    h = jnp.maximum(h, 0.0).astype(w2.dtype)
    y = (jnp.dot(h, w2, preferred_element_type=jnp.float32)
         + jnp.asarray(b2, jnp.float32).reshape(1, -1))
    return y.astype(out_dtype)


def _ref_forward(params, x, out_shape, num_classes, max_shape=(1, 1, 1, 1),
                 class_pred=False, compute_dtype=jnp.bfloat16):
    if class_pred:
        y = _ref_mlp(x, params["w1"], params["b1"], params["wc"], params["bc"],
                     compute_dtype)
        return y.reshape(x.shape[0], num_classes, out_shape[1])
    y = _ref_mlp(x, params["w1"], params["b1"], params["w2"], params["b2"],
                 compute_dtype)
    y = y.reshape(-1, *out_shape)
    if sum(max_shape[2:]) > 0:
        y = y[:, :, :, :max_shape[2], :max_shape[3]]
    return y


if __name__ == "__main__":
    in_features = 32
    hid = (64,)
    out_shape = (4, 4, 3, 3)          # prod = 144; out_shape[0] == out_shape[1]
    num_classes = 10
    B = 16

    key = jax.random.PRNGKey(0)
    kx, kp, kp2, kx2 = jax.random.split(key, 4)
    x = jax.random.normal(kx, (B, in_features), jnp.float32)
    params = init_mlp_decoder_params(kp, in_features, hid, out_shape, num_classes)

    cdt = jnp.bfloat16
    tol = dict(atol=5e-3, rtol=5e-2)   # bf16 operands, f32 accumulation

    # One-time weight prep (padding / max_shape column-gather / bf16 cast).
    prep_sliced = prepare_mlp_decoder(params, out_shape, num_classes,
                                      max_shape=(1, 1, 1, 1), compute_dtype=cdt)
    prep_full = prepare_mlp_decoder(params, out_shape, num_classes,
                                    max_shape=(0, 0, 0, 0), compute_dtype=cdt)

    # --- default branch: class_pred=False, max_shape=(1,1,1,1) (pre-gathered w2) ---
    y_dec = jax.block_until_ready(
        mlp_decoder_forward(prep_sliced, x, class_pred=False, use_pallas=True))
    y_ref = _ref_forward(params, x, out_shape, num_classes, (1, 1, 1, 1), False, cdt)
    assert y_dec.shape == (B, out_shape[0], out_shape[1], 1, 1), y_dec.shape
    assert jnp.allclose(y_dec, y_ref, **tol)

    # --- no-slice branch (sum(max_shape[2:]) == 0): full (3,3) decode ---
    y_full = jax.block_until_ready(
        mlp_decoder_forward(prep_full, x, class_pred=False, use_pallas=True))
    y_full_ref = _ref_forward(params, x, out_shape, num_classes, (0, 0, 0, 0), False, cdt)
    assert y_full.shape == (B, *out_shape), y_full.shape
    assert jnp.allclose(y_full, y_full_ref, **tol)

    # --- class_pred=True branch ---
    y_cls = jax.block_until_ready(
        mlp_decoder_forward(prep_sliced, x, class_pred=True, use_pallas=True))
    y_cls_ref = _ref_forward(params, x, out_shape, num_classes, class_pred=True,
                             compute_dtype=cdt)
    assert y_cls.shape == (B, num_classes, out_shape[1]), y_cls.shape
    assert jnp.allclose(y_cls, y_cls_ref, **tol)

    # --- ragged batch (not a multiple of the 16-row alignment) -> batch padding ---
    x13 = x[:13]
    y13 = jax.block_until_ready(
        mlp_decoder_forward(prep_sliced, x13, class_pred=False, use_pallas=True))
    y13_ref = _ref_forward(params, x13, out_shape, num_classes, (1, 1, 1, 1), False, cdt)
    assert y13.shape == (13, out_shape[0], out_shape[1], 1, 1), y13.shape
    assert jnp.allclose(y13, y13_ref, **tol)

    # --- f32 compute path (exact against the reference) ---
    prep_f32 = prepare_mlp_decoder(params, out_shape, num_classes, (1, 1, 1, 1),
                                   compute_dtype=jnp.float32)
    y_f32 = jax.block_until_ready(
        mlp_decoder_forward(prep_f32, x, class_pred=False, use_pallas=True))
    y_f32_ref = _ref_forward(params, x, out_shape, num_classes, (1, 1, 1, 1), False,
                             jnp.float32)
    assert jnp.allclose(y_f32, y_f32_ref, atol=1e-5, rtol=1e-5)

    # --- auto mode: tiny problem takes the XLA bypass (still correct) ---
    y_auto = jax.block_until_ready(mlp_decoder_forward(prep_sliced, x, class_pred=False))
    assert jnp.allclose(y_auto, y_ref, **tol)

    # --- larger decode exercises multiple w2 column tiles + multiple batch tiles ---
    out_shape_big = (16, 16, 3, 3)    # prod = 2304 -> several lane-dense column tiles
    B_big = 128
    params_big = init_mlp_decoder_params(kp2, in_features, hid, out_shape_big,
                                         num_classes)
    prep_big = prepare_mlp_decoder(params_big, out_shape_big, num_classes,
                                   max_shape=(0, 0, 0, 0), compute_dtype=cdt)
    x_big = jax.random.normal(kx2, (B_big, in_features), jnp.float32)
    y_big = jax.block_until_ready(
        mlp_decoder_forward(prep_big, x_big, class_pred=False))  # auto -> kernel path
    y_big_ref = _ref_forward(params_big, x_big, out_shape_big, num_classes,
                             (0, 0, 0, 0), False, cdt)
    assert y_big.shape == (B_big, *out_shape_big), y_big.shape
    assert jnp.allclose(y_big, y_big_ref, **tol)

    print("KERNEL_OK")
</pallas_src>

<mosaic_0001>
module attributes {stable_mosaic.version = 11 : i64} {
  func.func @_fused_mlp_kernel(%arg0: i32, %arg1: i32, %arg2: memref<16x32xbf16, #tpu.memory_space<vmem>>, %arg3: memref<32x64xbf16, #tpu.memory_space<vmem>>, %arg4: memref<1x64xf32, #tpu.memory_space<vmem>>, %arg5: memref<64x128xbf16, #tpu.memory_space<vmem>>, %arg6: memref<1x128xf32, #tpu.memory_space<vmem>>, %arg7: memref<16x128xf32, #tpu.memory_space<vmem>>) attributes {dimension_semantics = [#tpu.dimension_semantics<parallel>, #tpu.dimension_semantics<parallel>], iteration_bounds = array<i64: 1, 1>, scalar_prefetch = 0 : i64, scratch_operands = 0 : i64, tpu.core_type = #tpu.core_type<tc>, window_params = [{transform_indices = @transform_0, window_bounds = array<i64: 16, 32>}, {pipeline_mode = #tpu.pipeline_mode<synchronous>, transform_indices = @transform_1, window_bounds = array<i64: 32, 64>}, {pipeline_mode = #tpu.pipeline_mode<synchronous>, transform_indices = @transform_2, window_bounds = array<i64: 1, 64>}, {transform_indices = @transform_3, window_bounds = array<i64: 64, 128>}, {transform_indices = @transform_4, window_bounds = array<i64: 1, 128>}, {transform_indices = @transform_5, window_bounds = array<i64: 16, 128>}]} {
    %c0 = arith.constant 0 : index
    %c0_0 = arith.constant 0 : index
    %0 = vector.load %arg2[%c0, %c0_0] : memref<16x32xbf16, #tpu.memory_space<vmem>>, vector<16x32xbf16>
    %c0_1 = arith.constant 0 : index
    %c0_2 = arith.constant 0 : index
    %1 = vector.load %arg3[%c0_1, %c0_2] : memref<32x64xbf16, #tpu.memory_space<vmem>>, vector<32x64xbf16>
    %cst = arith.constant dense<0.000000e+00> : vector<16x64xf32>
    %2 = tpu.matmul %0, %1, %cst {dimension_numbers = #tpu.dot_dimension_numbers<[1], [0], [0], [1], [0, 0, 1, 1], [], []>} : vector<16x32xbf16>, vector<32x64xbf16>, vector<16x64xf32> -> vector<16x64xf32>
    %c0_3 = arith.constant 0 : index
    %c0_4 = arith.constant 0 : index
    %3 = vector.load %arg4[%c0_3, %c0_4] : memref<1x64xf32, #tpu.memory_space<vmem>>, vector<1x64xf32>
    %4 = vector.broadcast %3 : vector<1x64xf32> to vector<16x64xf32>
    %5 = arith.addf %2, %4 : vector<16x64xf32>
    %cst_5 = arith.constant 0.000000e+00 : f32
    %6 = vector.broadcast %cst_5 : f32 to vector<16x64xf32>
    %7 = arith.maximumf %5, %6 : vector<16x64xf32>
    %8 = arith.truncf %7 : vector<16x64xf32> to vector<16x64xbf16>
    %c0_6 = arith.constant 0 : index
    %c0_7 = arith.constant 0 : index
    %9 = vector.load %arg5[%c0_6, %c0_7] : memref<64x128xbf16, #tpu.memory_space<vmem>>, vector<64x128xbf16>
    %cst_8 = arith.constant dense<0.000000e+00> : vector<16x128xf32>
    %10 = tpu.matmul %8, %9, %cst_8 {dimension_numbers = #tpu.dot_dimension_numbers<[1], [0], [0], [1], [0, 0, 1, 1], [], []>} : vector<16x64xbf16>, vector<64x128xbf16>, vector<16x128xf32> -> vector<16x128xf32>
    %c0_9 = arith.constant 0 : index
    %c0_10 = arith.constant 0 : index
    %11 = vector.load %arg6[%c0_9, %c0_10] : memref<1x128xf32, #tpu.memory_space<vmem>>, vector<1x128xf32>
    %12 = vector.broadcast %11 : vector<1x128xf32> to vector<16x128xf32>
    %13 = arith.addf %10, %12 : vector<16x128xf32>
    %c0_11 = arith.constant 0 : index
    %c0_12 = arith.constant 0 : index
    %14 = vector.load %arg7[%c0_11, %c0_12] : memref<16x128xf32, #tpu.memory_space<vmem>>, vector<16x128xf32>
    tpu.vector_store %arg7[%c0_11, %c0_12], %13 {strides = array<i32>} : memref<16x128xf32, #tpu.memory_space<vmem>>, vector<16x128xf32>,
    return
  }
  func.func @transform_0(%arg0: i32, %arg1: i32) -> (i32, i32) {
    %c0_i32 = arith.constant 0 : i32
    %c0_i32_0 = arith.constant 0 : i32
    return %arg1, %c0_i32 : i32, i32
  }
  func.func @transform_1(%arg0: i32, %arg1: i32) -> (i32, i32) {
    %c0_i32 = arith.constant 0 : i32
    %c0_i32_0 = arith.constant 0 : i32
    %c0_i32_1 = arith.constant 0 : i32
    return %c0_i32, %c0_i32_0 : i32, i32
  }
  func.func @transform_2(%arg0: i32, %arg1: i32) -> (i32, i32) {
    %c0_i32 = arith.constant 0 : i32
    %c0_i32_0 = arith.constant 0 : i32
    %c0_i32_1 = arith.constant 0 : i32
    return %c0_i32, %c0_i32_0 : i32, i32
  }
  func.func @transform_3(%arg0: i32, %arg1: i32) -> (i32, i32) {
    %c0_i32 = arith.constant 0 : i32
    %c0_i32_0 = arith.constant 0 : i32
    return %c0_i32, %arg0 : i32, i32
  }
  func.func @transform_4(%arg0: i32, %arg1: i32) -> (i32, i32) {
    %c0_i32 = arith.constant 0 : i32
    %c0_i32_0 = arith.constant 0 : i32
    return %c0_i32, %arg0 : i32, i32
  }
  func.func @transform_5(%arg0: i32, %arg1: i32) -> (i32, i32) {
    %c0_i32 = arith.constant 0 : i32
    return %arg1, %arg0 : i32, i32
  }
}

</mosaic_0001>

<bundles_post_ra>
// kernel: tpu_custom_call.1
= control target key start
LH: loop header
LB: loop body
LE: loop exit
PB: predicated region body
PF: predicated region fallthrough
CT: control target
= control target key end

     0   :  { %10 = vsyncpa [#allocation3], 0  ;;  %s445_s0 = inlined_call_operand.hbm [shape: bf16[16,32], index: 0, kind: input, shape index: {}]   ;;  %s446_s1 = inlined_call_operand.hbm [shape: bf16[32,64], index: 1, kind: input, shape index: {}]   ;;  %s447_s2 = inlined_call_operand.vmem [shape: f32[1,64], index: 2, kind: input, shape index: {}]   ;;  %s448_s3 = inlined_call_operand.hbm [shape: bf16[64,128], index: 3, kind: input, shape index: {}]   ;;  %s449_s4 = inlined_call_operand.vmem [shape: f32[1,128], index: 4, kind: input, shape index: {}]   ;;  %s450_s5 = inlined_call_operand.hbm [shape: f32[16,128], index: 5, kind: output, shape index: {}]  }
   0x1   :  { %11 = vsyncpa [#allocation6], 0 }
   0x2   :  { %12 = vsyncpa [#allocation4], 0  ;;  %s387_s18 = smov [#allocation5]   ;;  %s388_s20 = smov [#allocation2]  }
   0x3   :  { %s30_s19 = sshll.u32 %s387_s18, 4  ;;  %s18_s21 = sshll.u32 %s388_s20, 4  ;;  %s31_s19 = int_to_ptr.vmem [resolvable:$true] %s30_s19  ;;  %s19_s21 = int_to_ptr.vmem [resolvable:$true] %s18_s21 }
   0x4   :  { %s309_s22 = scalar_lea.vmem %s31_s19, 256  ;;  %p314_p1 = scmp.lt.s32.totalorder %s31_s19, %s31_s19 }
   0x5   :  { %p310_p0 = scmp.ne.s32.totalorder %s31_s19, %s309_s22  ;;  %p315_p2 = scmp.lt.s32.totalorder %s309_s22, %s309_s22 }
   0x7   :  { %p316_p3 = por %p315_p2, %p314_p1 }
   0x9   :  { %p317_p4 = pnand %p316_p3, %p310_p0 }
   0xb   :  { %320 = shalt.err (!%p317_p4)
}
   0xc   :  { %s389_s23 = smov 64   ;;  %s390_s24 = smov 4  }
   0xd   :  { %36 = dma.hbm_to_vmem [thread:$0]  %s446_s1, 256, %s31_s19, [#allocation6], %s389_s23, %s389_s23, %s390_s24  }
   0xe   :  { %s329_s27 = scalar_lea.vmem %s19_s21, 128  ;;  %p334_p6 = scmp.lt.s32.totalorder %s19_s21, %s19_s21 }
   0xf   :  { %p330_p5 = scmp.ne.s32.totalorder %s19_s21, %s329_s27  ;;  %p335_p7 = scmp.lt.s32.totalorder %s329_s27, %s329_s27 }
  0x11   :  { %p336_p8 = por %p335_p7, %p334_p6 }
  0x13   :  { %p337_p9 = pnand %p336_p8, %p330_p5 }
  0x15   :  { %340 = shalt.err (!%p337_p9)
}
  0x16   :  { %24 = dma.hbm_to_vmem [thread:$0]  %s445_s0, 128, %s19_s21, [#allocation3], %s389_s23, %s389_s23, %s390_s24  }
  0x17   :  { %s391_s30 = smov [#allocation7]  }
  0x18   :  { %s44_s6 = sshll.u32 %s391_s30, 4  ;;  %s45_s6 = int_to_ptr.vmem [resolvable:$true] %s44_s6 }
  0x19   :  { %s349_s7 = scalar_lea.vmem %s45_s6, 512  ;;  %p354_p11 = scmp.lt.s32.totalorder %s45_s6, %s45_s6 }
  0x1a   :  { %p350_p10 = scmp.ne.s32.totalorder %s45_s6, %s349_s7  ;;  %p355_p12 = scmp.lt.s32.totalorder %s349_s7, %s349_s7 }
  0x1c   :  { %p356_p13 = por %p355_p12, %p354_p11 }
  0x1e   :  { %p357_p0 = pnand %p356_p13, %p350_p10 }
  0x20   :  { %360 = shalt.err (!%p357_p0)
}
  0x21   :  { %50 = dma.hbm_to_vmem [thread:$0]  %s448_s3, 512, %s45_s6, [#allocation6], %s389_s23, %s389_s23, %s390_s24  }
  0x22   :  { %381 = dma.done.wait [#allocation3], 128  }
  0x23   :  { %382 = vsyncadd [#allocation3], 4294967168 }
  0x24   :  { %383 = dma.done.wait [#allocation6], 768  }
  0x25   :  { %384 = vsyncadd [#allocation6], 4294966528  ;;  %v392_v0 = vmov 0.0   ;;  %vm393_vm0 = vmmov 0   ;;  %v294_v1 = vld [vmem:[#allocation5 + $0x8] sm:$0xff]   ;;  %v295_v2 = vld [vmem:[#allocation5] sm:$0xff]  }
  0x26   :  { %264 = vmatprep.subr.bf16.mxu0 %v392_v0  ;;  %268 = vmatprep.mubr.msk.bf16.mxu0 %vm393_vm0, %v392_v0  ;;  %v297_v3 = vld [vmem:[#allocation7 + $0x18] sm:$0xff]   ;;  %v296_v4 = vld [vmem:[#allocation2] sm:$0xff]   ;;  %vm93_vm1 = vcmask 261120   ;;  %v298_v5 = vld [vmem:[#allocation7 + $0x10] sm:$0xff]   ;;  %vm180_vm2 = vcmask 523264   ;;  %s394_s11 = smov [#allocation8]  }
  0x27   :  { %272 = vmatprep.subr.bf16.mxu1 %v392_v0  ;;  %280 = vmatprep.mubr.msk.bf16.mxu1 %vm393_vm0, %v392_v0  ;;  %v299_v6 = vld [vmem:[#allocation7 + $0x8] sm:$0xff]   ;;  %v300_v7 = vld [vmem:[#allocation7] sm:$0xff]   ;;  %s232_s12 = sshll.u32 %s394_s11, 4  ;;  %s233_s12 = int_to_ptr.vmem [resolvable:$true] %s232_s12 }
  0x28   :  { %265 = vmatpush3.bf16.msra.mxu0 %v294_v1  ;;  %273 = vmatpush3.bf16.msra.mxu1 %v297_v3  ;;  %v245_v8 = vld [vmem:[%s447_s2] ss:$0 sm:$0xff]  ;;  %s361_s2 = scalar_lea.vmem %s233_s12, 256  ;;  %p366_p2 = scmp.lt.s32.totalorder %s233_s12, %s233_s12 }
  0x29   :  { %266 = vmatprep.subr.bf16.mxu0 %v392_v0  ;;  %274 = vmatprep.subr.bf16.mxu1 %v392_v0  ;;  %v250_v18 = vld [vmem:[%s449_s4] ss:$0 sm:$0xff]  ;;  %p362_p1 = scmp.ne.s32.totalorder %s233_s12, %s361_s2  ;;  %p367_p3 = scmp.lt.s32.totalorder %s361_s2, %s361_s2 }
  0x2b   :  { %p368_p4 = por %p367_p3, %p366_p2 }
  0x2c   :  { %267 = vmatpush3.bf16.msra.mxu0 %v295_v2  ;;  %275 = vmatpush3.bf16.msra.mxu1 %v298_v5 }
  0x2d   :  { %276 = vmatprep.subr.bf16.mxu1 %v392_v0  ;;  %p369_p5 = pnand %p368_p4, %p362_p1 }
  0x2f   :  { %269 = vmatmul.mubr.msk.bf16.vlgmr.msra.gmra.mxu0 %vm93_vm1, %v296_v4 }
  0x30   :  { %277 = vmatpush3.bf16.msra.mxu1 %v299_v6 }
  0x31   :  { %278 = vmatprep.subr.bf16.mxu1 %v392_v0 }
  0x34   :  { %279 = vmatpush3.bf16.msra.mxu1 %v300_v7 }
  0xef   :  { %v131_v9 = vpop.f32.mrf.mxu0 }
  0xf0   :  { %v132_v11 = vadd.f32 %v245_v8, %v131_v9 }
  0xf1   :  { %v270_v10 = vpop.f32.mrf.mxu0 }
  0xf2   :  { %v138_v15 = vmax.f32 %v132_v11, 0.0 }
  0xf3   :  { %v134_v12 = vpop.f32.mrf.mxu0 }
  0xf4   :  { %v135_v13 = vadd.f32 %v245_v8, %v134_v12 }
  0xf5   :  { %v271_v14 = vpop.f32.mrf.mxu0 }
  0xf6   :  { %v139_v16 = vmax.f32 %v135_v13, 0.0 }
  0xf8   :  { %v140_v17 = vpack.c.bf16 %v139_v16, %v138_v15 }
  0xfa   :  { %281 = vmatmul.mubr.msk.bf16.vlgmr.msra.gmra.mxu1 %vm180_vm2, %v140_v17 }
 0x1ba   :  { %v218_v19 = vpop.f32.mrf.mxu1 }
 0x1bb   :  { %v219_v20 = vadd.f32 %v250_v18, %v218_v19 }
 0x1bc   :  { %v282_v21 = vpop.f32.mrf.mxu1 }
 0x1bd   :  { %225 = vst [vmem:[#allocation8] sm:$0xff] %v219_v20 }
 0x1be   :  { %v221_v22 = vpop.f32.mrf.mxu1 }
 0x1bf   :  { %v222_v23 = vadd.f32 %v250_v18, %v221_v22 }
 0x1c0   :  { %v283_v24 = vpop.f32.mrf.mxu1 }
 0x1c1   :  { %226 = vst [vmem:[#allocation8 + $0x8] sm:$0xff] %v222_v23 }
 0x1c2   :  { %372 = shalt.err (!%p369_p5)
}
 0x1c3   :  { %s395_s13 = smov 128   ;;  %s396_s4 = smov 8  }
 0x1c4   :  { %238 = dma.vmem_to_hbm [thread:$0]  %s233_s12, 256, %s450_s5, [#allocation4], %s395_s13, %s395_s13, %s396_s4  }
 0x1c5   :  { %385 = dma.done.wait [#allocation4], 256  }
 0x1c6   :  { %386 = vsyncadd [#allocation4], 4294967040 }
 0x1c7   :  { %242 = vsyncpa [#allocation3], 1 }
 0x1c8   :  { %243 = vsyncpa [#allocation6], 1 }
 0x1c9   :  { %244 = vsyncpa [#allocation4], 1 }

</bundles_post_ra>
